<compile_context>
chip_gen: v6e
topology: v6e:2x2x1
jax: 0.10.0
libtpu: 0.0.40
codegen_flags: <defaults>
</compile_context>

<pallas_src>
import functools

import jax
import jax.numpy as jnp
import numpy as np
from jax.experimental import pallas as pl
from jax.experimental.pallas import tpu as pltpu


def _depthwise_kernel(x_ref, w1_ref, s1_ref, b1_ref, a1_ref,
                      wdw_ref, s2_ref, b2_ref, a2_ref,
                      w3_ref, s3_ref, b3_ref,
                      o_ref, *, w2):
    # x_ref: (1, 2, 2, Cin, M) stride-parity planes of one batch element,
    #        M = H2*W2 (flattened quarter-res spatial, on lanes).
    # o_ref: (1, Cout, M)
    _, _, _, cin, m = x_ref.shape
    g = w1_ref.shape[0]

    # ---- ConvBlock 1: 1x1 conv (Cin -> G) + folded BN + PReLU, per parity plane
    y = {}
    for p in range(2):
        for q in range(2):
            t = jnp.dot(w1_ref[...], x_ref[0, p, q],
                        preferred_element_type=jnp.float32)        # (G, M)
            t = t * s1_ref[...] + b1_ref[...]
            t = jnp.where(t >= 0.0, t, a1_ref[...] * t)
            y[(p, q)] = t

    # ---- ConvBlock 2: depthwise 3x3, stride 2, pad 1 + folded BN + PReLU ----
    # z[i,j] = sum_{kh,kw} w[kh,kw] * y_full[2i+kh-1, 2j+kw-1]; with parity
    # planes Y_pq[a,b] = y_full[2a+p, 2b+q] the 9 taps become plain / row- /
    # col-shifted reads of Y00, Y01, Y10, Y11 (shifts done in-register).
    lane = jax.lax.broadcasted_iota(jnp.int32, (g, m), 1)
    is_col0 = (lane % w2) == 0                      # b == 0 border (flat layout)
    zero_col = jnp.zeros((g, 1), jnp.float32)
    zero_row = jnp.zeros((g, w2), jnp.float32)

    def shift_r(t):   # (a, b) <- (a, b-1), zero when b == 0
        s = jnp.concatenate([zero_col, t[:, :m - 1]], axis=1)
        return jnp.where(is_col0, 0.0, s)

    def shift_d(t):   # (a, b) <- (a-1, b), zero when a == 0
        return jnp.concatenate([zero_row, t[:, :m - w2]], axis=1)

    def wk(kh, kw):   # depthwise tap weight as (G, 1) column (lane-broadcast)
        return wdw_ref[:, 3 * kh + kw: 3 * kh + kw + 1]

    y00, y01, y10, y11 = y[(0, 0)], y[(0, 1)], y[(1, 0)], y[(1, 1)]
    s11 = shift_r(y11)
    z = (wk(1, 1) * y00
         + wk(1, 2) * y01 + wk(1, 0) * shift_r(y01)
         + wk(2, 1) * y10 + wk(0, 1) * shift_d(y10)
         + wk(2, 2) * y11 + wk(0, 2) * shift_d(y11)
         + wk(2, 0) * s11 + wk(0, 0) * shift_d(s11))
    z = z * s2_ref[...] + b2_ref[...]
    z = jnp.where(z >= 0.0, z, a2_ref[...] * z)

    # ---- Linear_block: 1x1 projection (G -> Cout) + folded BN ---------------
    out = jnp.dot(w3_ref[...], z, preferred_element_type=jnp.float32)  # (Cout, M)
    out = out * s3_ref[...] + b3_ref[...]
    o_ref[0] = out.astype(o_ref.dtype)


@functools.partial(jax.jit, static_argnames=("residual",))
def depthwise_forward(x_nchw, params, residual=False):
    # TODO(synk): only the default DepthWise config (kernel=(3,3), stride=(2,2),
    # padding=(1,1)) is implemented by the kernel.
    if residual:
        raise NotImplementedError(
            "residual=True requires stride=(1,1) and in_c == out_c; this "
            "stride-2 kernel does not implement that configuration")

    N, Cin, H, W = x_nchw.shape
    assert H % 2 == 0 and W % 2 == 0, "even spatial dims required for stride 2"
    H2, W2 = H // 2, W // 2
    M = H2 * W2
    G = params["w1"].shape[0]
    Cout = params["w3"].shape[0]

    # Single wrapper relayout: stride-parity split of the input tensor.
    # (N,Cin,H,W) -> (N,2,2,Cin,H2*W2): channels on sublanes, flat spatial on
    # lanes.  The output comes back NCHW-flat, needing only a free reshape.
    x = x_nchw.astype(jnp.float32)
    x_par = (x.reshape(N, Cin, H2, 2, W2, 2)
              .transpose(0, 3, 5, 1, 2, 4)
              .reshape(N, 2, 2, Cin, M))

    def col(v):  # (C,) -> (C, 1): broadcasts over the lane (spatial) dim
        return v.reshape(-1, 1).astype(jnp.float32)

    args = (
        x_par,
        params["w1"].astype(jnp.float32),                     # (G, Cin)
        col(params["bn1_scale"]), col(params["bn1_shift"]), col(params["alpha1"]),
        params["wdw"].reshape(G, 9).astype(jnp.float32),      # (G, 9) taps
        col(params["bn2_scale"]), col(params["bn2_shift"]), col(params["alpha2"]),
        params["w3"].astype(jnp.float32),                     # (Cout, G)
        col(params["bn3_scale"]), col(params["bn3_shift"]),
    )

    def const_spec(shape):
        return pl.BlockSpec(shape, lambda n, _s=shape: (0,) * len(_s))

    in_specs = [
        pl.BlockSpec((1, 2, 2, Cin, M), lambda n: (n, 0, 0, 0, 0)),
        const_spec((G, Cin)),
        const_spec((G, 1)), const_spec((G, 1)), const_spec((G, 1)),
        const_spec((G, 9)),
        const_spec((G, 1)), const_spec((G, 1)), const_spec((G, 1)),
        const_spec((Cout, G)),
        const_spec((Cout, 1)), const_spec((Cout, 1)),
    ]
    out_spec = pl.BlockSpec((1, Cout, M), lambda n: (n, 0, 0))

    out_flat = pl.pallas_call(
        functools.partial(_depthwise_kernel, w2=W2),
        out_shape=jax.ShapeDtypeStruct((N, Cout, M), jnp.float32),
        grid_spec=pltpu.PrefetchScalarGridSpec(
            num_scalar_prefetch=0,
            grid=(N,),
            in_specs=in_specs,
            out_specs=out_spec,
        ),
        compiler_params=pltpu.CompilerParams(
            dimension_semantics=("parallel",)),
    )(*args)

    return out_flat.reshape(N, Cout, H2, W2)   # free reshape; already NCHW


def reference_forward(x_nchw, params, residual=False):
    """Pure-JAX NCHW reference (same math as the PyTorch module, BN folded)."""
    x = x_nchw.astype(jnp.float32)
    n, cin, h, w = x.shape
    h2, w2 = h // 2, w // 2
    g = params["w1"].shape[0]

    def bc(v):  # (C,) -> (1, C, 1, 1)
        return v.reshape(1, -1, 1, 1)

    y = jnp.einsum("nchw,gc->nghw", x, params["w1"])
    y = y * bc(params["bn1_scale"]) + bc(params["bn1_shift"])
    y = jnp.where(y >= 0, y, bc(params["alpha1"]) * y)

    yp = jnp.pad(y, ((0, 0), (0, 0), (1, 1), (1, 1)))
    acc = jnp.zeros((n, g, h2, w2), jnp.float32)
    for kh in range(3):
        for kw in range(3):
            acc = acc + (yp[:, :, kh:kh + 2 * h2:2, kw:kw + 2 * w2:2]
                         * params["wdw"][:, kh, kw].reshape(1, -1, 1, 1))
    z = acc * bc(params["bn2_scale"]) + bc(params["bn2_shift"])
    z = jnp.where(z >= 0, z, bc(params["alpha2"]) * z)

    o = jnp.einsum("nghw,og->nohw", z, params["w3"])
    o = o * bc(params["bn3_scale"]) + bc(params["bn3_shift"])
    if residual:
        o = o + x_nchw
    return o


if __name__ == "__main__":
    key = jax.random.PRNGKey(0)
    keys = jax.random.split(key, 10)

    # DepthWise(in_c=4, out_c=8, groups=8) at small spatial size.
    N, Cin, H, W = 2, 4, 16, 16
    G, Cout = 8, 8

    def normal(k, shape, scale=0.2):
        return scale * jax.random.normal(k, shape, jnp.float32)

    def make_bn(k, c):
        k1, k2, k3, k4 = jax.random.split(k, 4)
        gamma = 1.0 + 0.1 * jax.random.normal(k1, (c,), jnp.float32)
        beta = 0.1 * jax.random.normal(k2, (c,), jnp.float32)
        mean = 0.1 * jax.random.normal(k3, (c,), jnp.float32)
        var = 1.0 + 0.1 * jax.random.uniform(k4, (c,), jnp.float32)
        scale = gamma / jnp.sqrt(var + 1e-5)          # PyTorch BN eps default
        shift = beta - mean * scale
        return scale, shift

    bn1_scale, bn1_shift = make_bn(keys[1], G)
    bn2_scale, bn2_shift = make_bn(keys[2], G)
    bn3_scale, bn3_shift = make_bn(keys[3], Cout)

    params = {
        # Conv2d(Cin, G, 1x1) weight (G, Cin, 1, 1) stored squeezed as (G, Cin)
        "w1": normal(keys[4], (G, Cin)),
        "bn1_scale": bn1_scale, "bn1_shift": bn1_shift,
        "alpha1": 0.25 + 0.05 * jax.random.normal(keys[5], (G,), jnp.float32),
        # depthwise Conv2d(G, G, 3x3, groups=G) weight (G, 1, 3, 3) stored (G, 3, 3)
        "wdw": normal(keys[6], (G, 3, 3)),
        "bn2_scale": bn2_scale, "bn2_shift": bn2_shift,
        "alpha2": 0.25 + 0.05 * jax.random.normal(keys[7], (G,), jnp.float32),
        # Conv2d(G, Cout, 1x1) weight (Cout, G, 1, 1) stored squeezed as (Cout, G)
        "w3": normal(keys[8], (Cout, G)),
        "bn3_scale": bn3_scale, "bn3_shift": bn3_shift,
    }

    x = jax.random.normal(keys[0], (N, Cin, H, W), jnp.float32)

    out = jax.block_until_ready(depthwise_forward(x, params, residual=False))
    ref = reference_forward(x, params, residual=False)

    assert out.shape == (N, Cout, H // 2, W // 2)
    np.testing.assert_allclose(np.asarray(out), np.asarray(ref), rtol=2e-3, atol=2e-3)

    print("KERNEL_OK")
</pallas_src>

<mosaic_0001>
module attributes {stable_mosaic.version = 11 : i64} {
  func.func @_depthwise_kernel(%arg0: i32, %arg1: memref<1x2x2x4x64xf32, #tpu.memory_space<vmem>>, %arg2: memref<8x4xf32, #tpu.memory_space<vmem>>, %arg3: memref<8x1xf32, #tpu.memory_space<vmem>>, %arg4: memref<8x1xf32, #tpu.memory_space<vmem>>, %arg5: memref<8x1xf32, #tpu.memory_space<vmem>>, %arg6: memref<8x9xf32, #tpu.memory_space<vmem>>, %arg7: memref<8x1xf32, #tpu.memory_space<vmem>>, %arg8: memref<8x1xf32, #tpu.memory_space<vmem>>, %arg9: memref<8x1xf32, #tpu.memory_space<vmem>>, %arg10: memref<8x8xf32, #tpu.memory_space<vmem>>, %arg11: memref<8x1xf32, #tpu.memory_space<vmem>>, %arg12: memref<8x1xf32, #tpu.memory_space<vmem>>, %arg13: memref<1x8x64xf32, #tpu.memory_space<vmem>>) attributes {dimension_semantics = [#tpu.dimension_semantics<parallel>], iteration_bounds = array<i64: 2>, scalar_prefetch = 0 : i64, scratch_operands = 0 : i64, tpu.core_type = #tpu.core_type<tc>, window_params = [{transform_indices = @transform_0, window_bounds = array<i64: 1, 2, 2, 4, 64>}, {pipeline_mode = #tpu.pipeline_mode<synchronous>, transform_indices = @transform_1, window_bounds = array<i64: 8, 4>}, {pipeline_mode = #tpu.pipeline_mode<synchronous>, transform_indices = @transform_2, window_bounds = array<i64: 8, 1>}, {pipeline_mode = #tpu.pipeline_mode<synchronous>, transform_indices = @transform_3, window_bounds = array<i64: 8, 1>}, {pipeline_mode = #tpu.pipeline_mode<synchronous>, transform_indices = @transform_4, window_bounds = array<i64: 8, 1>}, {pipeline_mode = #tpu.pipeline_mode<synchronous>, transform_indices = @transform_5, window_bounds = array<i64: 8, 9>}, {pipeline_mode = #tpu.pipeline_mode<synchronous>, transform_indices = @transform_6, window_bounds = array<i64: 8, 1>}, {pipeline_mode = #tpu.pipeline_mode<synchronous>, transform_indices = @transform_7, window_bounds = array<i64: 8, 1>}, {pipeline_mode = #tpu.pipeline_mode<synchronous>, transform_indices = @transform_8, window_bounds = array<i64: 8, 1>}, {pipeline_mode = #tpu.pipeline_mode<synchronous>, transform_indices = @transform_9, window_bounds = array<i64: 8, 8>}, {pipeline_mode = #tpu.pipeline_mode<synchronous>, transform_indices = @transform_10, window_bounds = array<i64: 8, 1>}, {pipeline_mode = #tpu.pipeline_mode<synchronous>, transform_indices = @transform_11, window_bounds = array<i64: 8, 1>}, {transform_indices = @transform_12, window_bounds = array<i64: 1, 8, 64>}]} {
    %c0 = arith.constant 0 : index
    %c0_0 = arith.constant 0 : index
    %0 = vector.load %arg2[%c0, %c0_0] : memref<8x4xf32, #tpu.memory_space<vmem>>, vector<8x4xf32>
    %c0_1 = arith.constant 0 : index
    %c0_2 = arith.constant 0 : index
    %c0_3 = arith.constant 0 : index
    %c0_4 = arith.constant 0 : index
    %c0_5 = arith.constant 0 : index
    %1 = vector.load %arg1[%c0_1, %c0_2, %c0_3, %c0_4, %c0_5] : memref<1x2x2x4x64xf32, #tpu.memory_space<vmem>>, vector<1x1x1x4x64xf32>
    %2 = vector.shape_cast %1 : vector<1x1x1x4x64xf32> to vector<4x64xf32>
    %cst = arith.constant dense<0.000000e+00> : vector<8x64xf32>
    %3 = tpu.matmul %0, %2, %cst {dimension_numbers = #tpu.dot_dimension_numbers<[1], [0], [0], [1], [0, 0, 1, 1], [], []>} : vector<8x4xf32>, vector<4x64xf32>, vector<8x64xf32> -> vector<8x64xf32>
    %c0_6 = arith.constant 0 : index
    %c0_7 = arith.constant 0 : index
    %4 = vector.load %arg3[%c0_6, %c0_7] : memref<8x1xf32, #tpu.memory_space<vmem>>, vector<8x1xf32>
    %5 = vector.broadcast %4 : vector<8x1xf32> to vector<8x64xf32>
    %6 = arith.mulf %3, %5 : vector<8x64xf32>
    %c0_8 = arith.constant 0 : index
    %c0_9 = arith.constant 0 : index
    %7 = vector.load %arg4[%c0_8, %c0_9] : memref<8x1xf32, #tpu.memory_space<vmem>>, vector<8x1xf32>
    %8 = vector.broadcast %7 : vector<8x1xf32> to vector<8x64xf32>
    %9 = arith.addf %6, %8 : vector<8x64xf32>
    %cst_10 = arith.constant 0.000000e+00 : f32
    %10 = vector.broadcast %cst_10 : f32 to vector<8x64xf32>
    %11 = arith.cmpf oge, %9, %10 : vector<8x64xf32>
    %c0_11 = arith.constant 0 : index
    %c0_12 = arith.constant 0 : index
    %12 = vector.load %arg5[%c0_11, %c0_12] : memref<8x1xf32, #tpu.memory_space<vmem>>, vector<8x1xf32>
    %13 = vector.broadcast %12 : vector<8x1xf32> to vector<8x64xf32>
    %14 = arith.mulf %13, %9 : vector<8x64xf32>
    %15 = arith.select %11, %9, %14 : vector<8x64xi1>, vector<8x64xf32>
    %c0_13 = arith.constant 0 : index
    %c0_14 = arith.constant 0 : index
    %16 = vector.load %arg2[%c0_13, %c0_14] : memref<8x4xf32, #tpu.memory_space<vmem>>, vector<8x4xf32>
    %c0_15 = arith.constant 0 : index
    %c0_16 = arith.constant 0 : index
    %c1 = arith.constant 1 : index
    %c0_17 = arith.constant 0 : index
    %c0_18 = arith.constant 0 : index
    %17 = vector.load %arg1[%c0_15, %c0_16, %c1, %c0_17, %c0_18] : memref<1x2x2x4x64xf32, #tpu.memory_space<vmem>>, vector<1x1x1x4x64xf32>
    %18 = vector.shape_cast %17 : vector<1x1x1x4x64xf32> to vector<4x64xf32>
    %cst_19 = arith.constant dense<0.000000e+00> : vector<8x64xf32>
    %19 = tpu.matmul %16, %18, %cst_19 {dimension_numbers = #tpu.dot_dimension_numbers<[1], [0], [0], [1], [0, 0, 1, 1], [], []>} : vector<8x4xf32>, vector<4x64xf32>, vector<8x64xf32> -> vector<8x64xf32>
    %c0_20 = arith.constant 0 : index
    %c0_21 = arith.constant 0 : index
    %20 = vector.load %arg3[%c0_20, %c0_21] : memref<8x1xf32, #tpu.memory_space<vmem>>, vector<8x1xf32>
    %21 = vector.broadcast %20 : vector<8x1xf32> to vector<8x64xf32>
    %22 = arith.mulf %19, %21 : vector<8x64xf32>
    %c0_22 = arith.constant 0 : index
    %c0_23 = arith.constant 0 : index
    %23 = vector.load %arg4[%c0_22, %c0_23] : memref<8x1xf32, #tpu.memory_space<vmem>>, vector<8x1xf32>
    %24 = vector.broadcast %23 : vector<8x1xf32> to vector<8x64xf32>
    %25 = arith.addf %22, %24 : vector<8x64xf32>
    %cst_24 = arith.constant 0.000000e+00 : f32
    %26 = vector.broadcast %cst_24 : f32 to vector<8x64xf32>
    %27 = arith.cmpf oge, %25, %26 : vector<8x64xf32>
    %c0_25 = arith.constant 0 : index
    %c0_26 = arith.constant 0 : index
    %28 = vector.load %arg5[%c0_25, %c0_26] : memref<8x1xf32, #tpu.memory_space<vmem>>, vector<8x1xf32>
    %29 = vector.broadcast %28 : vector<8x1xf32> to vector<8x64xf32>
    %30 = arith.mulf %29, %25 : vector<8x64xf32>
    %31 = arith.select %27, %25, %30 : vector<8x64xi1>, vector<8x64xf32>
    %c0_27 = arith.constant 0 : index
    %c0_28 = arith.constant 0 : index
    %32 = vector.load %arg2[%c0_27, %c0_28] : memref<8x4xf32, #tpu.memory_space<vmem>>, vector<8x4xf32>
    %c0_29 = arith.constant 0 : index
    %c1_30 = arith.constant 1 : index
    %c0_31 = arith.constant 0 : index
    %c0_32 = arith.constant 0 : index
    %c0_33 = arith.constant 0 : index
    %33 = vector.load %arg1[%c0_29, %c1_30, %c0_31, %c0_32, %c0_33] : memref<1x2x2x4x64xf32, #tpu.memory_space<vmem>>, vector<1x1x1x4x64xf32>
    %34 = vector.shape_cast %33 : vector<1x1x1x4x64xf32> to vector<4x64xf32>
    %cst_34 = arith.constant dense<0.000000e+00> : vector<8x64xf32>
    %35 = tpu.matmul %32, %34, %cst_34 {dimension_numbers = #tpu.dot_dimension_numbers<[1], [0], [0], [1], [0, 0, 1, 1], [], []>} : vector<8x4xf32>, vector<4x64xf32>, vector<8x64xf32> -> vector<8x64xf32>
    %c0_35 = arith.constant 0 : index
    %c0_36 = arith.constant 0 : index
    %36 = vector.load %arg3[%c0_35, %c0_36] : memref<8x1xf32, #tpu.memory_space<vmem>>, vector<8x1xf32>
    %37 = vector.broadcast %36 : vector<8x1xf32> to vector<8x64xf32>
    %38 = arith.mulf %35, %37 : vector<8x64xf32>
    %c0_37 = arith.constant 0 : index
    %c0_38 = arith.constant 0 : index
    %39 = vector.load %arg4[%c0_37, %c0_38] : memref<8x1xf32, #tpu.memory_space<vmem>>, vector<8x1xf32>
    %40 = vector.broadcast %39 : vector<8x1xf32> to vector<8x64xf32>
    %41 = arith.addf %38, %40 : vector<8x64xf32>
    %cst_39 = arith.constant 0.000000e+00 : f32
    %42 = vector.broadcast %cst_39 : f32 to vector<8x64xf32>
    %43 = arith.cmpf oge, %41, %42 : vector<8x64xf32>
    %c0_40 = arith.constant 0 : index
    %c0_41 = arith.constant 0 : index
    %44 = vector.load %arg5[%c0_40, %c0_41] : memref<8x1xf32, #tpu.memory_space<vmem>>, vector<8x1xf32>
    %45 = vector.broadcast %44 : vector<8x1xf32> to vector<8x64xf32>
    %46 = arith.mulf %45, %41 : vector<8x64xf32>
    %47 = arith.select %43, %41, %46 : vector<8x64xi1>, vector<8x64xf32>
    %c0_42 = arith.constant 0 : index
    %c0_43 = arith.constant 0 : index
    %48 = vector.load %arg2[%c0_42, %c0_43] : memref<8x4xf32, #tpu.memory_space<vmem>>, vector<8x4xf32>
    %c0_44 = arith.constant 0 : index
    %c1_45 = arith.constant 1 : index
    %c1_46 = arith.constant 1 : index
    %c0_47 = arith.constant 0 : index
    %c0_48 = arith.constant 0 : index
    %49 = vector.load %arg1[%c0_44, %c1_45, %c1_46, %c0_47, %c0_48] : memref<1x2x2x4x64xf32, #tpu.memory_space<vmem>>, vector<1x1x1x4x64xf32>
    %50 = vector.shape_cast %49 : vector<1x1x1x4x64xf32> to vector<4x64xf32>
    %cst_49 = arith.constant dense<0.000000e+00> : vector<8x64xf32>
    %51 = tpu.matmul %48, %50, %cst_49 {dimension_numbers = #tpu.dot_dimension_numbers<[1], [0], [0], [1], [0, 0, 1, 1], [], []>} : vector<8x4xf32>, vector<4x64xf32>, vector<8x64xf32> -> vector<8x64xf32>
    %c0_50 = arith.constant 0 : index
    %c0_51 = arith.constant 0 : index
    %52 = vector.load %arg3[%c0_50, %c0_51] : memref<8x1xf32, #tpu.memory_space<vmem>>, vector<8x1xf32>
    %53 = vector.broadcast %52 : vector<8x1xf32> to vector<8x64xf32>
    %54 = arith.mulf %51, %53 : vector<8x64xf32>
    %c0_52 = arith.constant 0 : index
    %c0_53 = arith.constant 0 : index
    %55 = vector.load %arg4[%c0_52, %c0_53] : memref<8x1xf32, #tpu.memory_space<vmem>>, vector<8x1xf32>
    %56 = vector.broadcast %55 : vector<8x1xf32> to vector<8x64xf32>
    %57 = arith.addf %54, %56 : vector<8x64xf32>
    %cst_54 = arith.constant 0.000000e+00 : f32
    %58 = vector.broadcast %cst_54 : f32 to vector<8x64xf32>
    %59 = arith.cmpf oge, %57, %58 : vector<8x64xf32>
    %c0_55 = arith.constant 0 : index
    %c0_56 = arith.constant 0 : index
    %60 = vector.load %arg5[%c0_55, %c0_56] : memref<8x1xf32, #tpu.memory_space<vmem>>, vector<8x1xf32>
    %61 = vector.broadcast %60 : vector<8x1xf32> to vector<8x64xf32>
    %62 = arith.mulf %61, %57 : vector<8x64xf32>
    %63 = arith.select %59, %57, %62 : vector<8x64xi1>, vector<8x64xf32>
    %64 = tpu.iota {dimensions = array<i32: 1>} : vector<8x64xi32>
    %c8_i32 = arith.constant 8 : i32
    %c0_i32 = arith.constant 0 : i32
    %65 = arith.cmpi eq, %c8_i32, %c0_i32 : i32
    %c1_i32 = arith.constant 1 : i32
    %66 = arith.select %65, %c1_i32, %c8_i32 : i32
    %67 = vector.broadcast %66 : i32 to vector<8x64xi32>
    %68 = arith.remsi %64, %67 : vector<8x64xi32>
    %c0_i32_57 = arith.constant 0 : i32
    %69 = vector.broadcast %c0_i32_57 : i32 to vector<8x64xi32>
    %70 = arith.cmpi ne, %68, %69 : vector<8x64xi32>
    %c0_i32_58 = arith.constant 0 : i32
    %71 = vector.broadcast %c0_i32_58 : i32 to vector<8x64xi32>
    %72 = arith.cmpi slt, %68, %71 : vector<8x64xi32>
    %c0_i32_59 = arith.constant 0 : i32
    %73 = arith.cmpi slt, %66, %c0_i32_59 : i32
    %74 = vector.broadcast %73 : i1 to vector<8x64xi1>
    %75 = vector.broadcast %74 : vector<8x64xi1> to vector<8x64xi1>
    %76 = arith.xori %72, %75 : vector<8x64xi1>
    %77 = arith.andi %76, %70 : vector<8x64xi1>
    %78 = vector.broadcast %66 : i32 to vector<8x64xi32>
    %79 = arith.addi %68, %78 : vector<8x64xi32>
    %80 = arith.select %77, %79, %68 : vector<8x64xi1>, vector<8x64xi32>
    %c0_i32_60 = arith.constant 0 : i32
    %81 = vector.broadcast %c0_i32_60 : i32 to vector<8x64xi32>
    %82 = arith.cmpi eq, %80, %81 : vector<8x64xi32>
    %cst_61 = arith.constant 0.000000e+00 : f32
    %83 = vector.broadcast %cst_61 : f32 to vector<8x1xf32>
    %cst_62 = arith.constant 0.000000e+00 : f32
    %84 = vector.broadcast %cst_62 : f32 to vector<8x8xf32>
    %85 = vector.extract_strided_slice %63 {offsets = [0, 0], sizes = [8, 63], strides = [1, 1]} : vector<8x64xf32> to vector<8x63xf32>
    %86 = tpu.concatenate %83, %85 in 1 : vector<8x1xf32>, vector<8x63xf32> -> vector<8x64xf32>
    %cst_63 = arith.constant 0.000000e+00 : f32
    %87 = vector.broadcast %cst_63 : f32 to vector<8x64xf32>
    %88 = arith.select %82, %87, %86 : vector<8x64xi1>, vector<8x64xf32>
    %c0_64 = arith.constant 0 : index
    %c4 = arith.constant 4 : index
    %89 = vector.load %arg6[%c0_64, %c4] : memref<8x9xf32, #tpu.memory_space<vmem>>, vector<8x1xf32>
    %90 = vector.broadcast %89 : vector<8x1xf32> to vector<8x64xf32>
    %91 = arith.mulf %90, %15 : vector<8x64xf32>
    %c0_65 = arith.constant 0 : index
    %c5 = arith.constant 5 : index
    %92 = vector.load %arg6[%c0_65, %c5] : memref<8x9xf32, #tpu.memory_space<vmem>>, vector<8x1xf32>
    %93 = vector.broadcast %92 : vector<8x1xf32> to vector<8x64xf32>
    %94 = arith.mulf %93, %31 : vector<8x64xf32>
    %95 = arith.addf %91, %94 : vector<8x64xf32>
    %c0_66 = arith.constant 0 : index
    %c3 = arith.constant 3 : index
    %96 = vector.load %arg6[%c0_66, %c3] : memref<8x9xf32, #tpu.memory_space<vmem>>, vector<8x1xf32>
    %97 = vector.extract_strided_slice %31 {offsets = [0, 0], sizes = [8, 63], strides = [1, 1]} : vector<8x64xf32> to vector<8x63xf32>
    %98 = tpu.concatenate %83, %97 in 1 : vector<8x1xf32>, vector<8x63xf32> -> vector<8x64xf32>
    %cst_67 = arith.constant 0.000000e+00 : f32
    %99 = vector.broadcast %cst_67 : f32 to vector<8x64xf32>
    %100 = arith.select %82, %99, %98 : vector<8x64xi1>, vector<8x64xf32>
    %101 = vector.broadcast %96 : vector<8x1xf32> to vector<8x64xf32>
    %102 = arith.mulf %101, %100 : vector<8x64xf32>
    %103 = arith.addf %95, %102 : vector<8x64xf32>
    %c0_68 = arith.constant 0 : index
    %c7 = arith.constant 7 : index
    %104 = vector.load %arg6[%c0_68, %c7] : memref<8x9xf32, #tpu.memory_space<vmem>>, vector<8x1xf32>
    %105 = vector.broadcast %104 : vector<8x1xf32> to vector<8x64xf32>
    %106 = arith.mulf %105, %47 : vector<8x64xf32>
    %107 = arith.addf %103, %106 : vector<8x64xf32>
    %c0_69 = arith.constant 0 : index
    %c1_70 = arith.constant 1 : index
    %108 = vector.load %arg6[%c0_69, %c1_70] : memref<8x9xf32, #tpu.memory_space<vmem>>, vector<8x1xf32>
    %109 = vector.extract_strided_slice %47 {offsets = [0, 0], sizes = [8, 56], strides = [1, 1]} : vector<8x64xf32> to vector<8x56xf32>
    %110 = tpu.concatenate %84, %109 in 1 : vector<8x8xf32>, vector<8x56xf32> -> vector<8x64xf32>
    %111 = vector.broadcast %108 : vector<8x1xf32> to vector<8x64xf32>
    %112 = arith.mulf %111, %110 : vector<8x64xf32>
    %113 = arith.addf %107, %112 : vector<8x64xf32>
    %c0_71 = arith.constant 0 : index
    %c8 = arith.constant 8 : index
    %114 = vector.load %arg6[%c0_71, %c8] : memref<8x9xf32, #tpu.memory_space<vmem>>, vector<8x1xf32>
    %115 = vector.broadcast %114 : vector<8x1xf32> to vector<8x64xf32>
    %116 = arith.mulf %115, %63 : vector<8x64xf32>
    %117 = arith.addf %113, %116 : vector<8x64xf32>
    %c0_72 = arith.constant 0 : index
    %c2 = arith.constant 2 : index
    %118 = vector.load %arg6[%c0_72, %c2] : memref<8x9xf32, #tpu.memory_space<vmem>>, vector<8x1xf32>
    %119 = vector.extract_strided_slice %63 {offsets = [0, 0], sizes = [8, 56], strides = [1, 1]} : vector<8x64xf32> to vector<8x56xf32>
    %120 = tpu.concatenate %84, %119 in 1 : vector<8x8xf32>, vector<8x56xf32> -> vector<8x64xf32>
    %121 = vector.broadcast %118 : vector<8x1xf32> to vector<8x64xf32>
    %122 = arith.mulf %121, %120 : vector<8x64xf32>
    %123 = arith.addf %117, %122 : vector<8x64xf32>
    %c0_73 = arith.constant 0 : index
    %c6 = arith.constant 6 : index
    %124 = vector.load %arg6[%c0_73, %c6] : memref<8x9xf32, #tpu.memory_space<vmem>>, vector<8x1xf32>
    %125 = vector.broadcast %124 : vector<8x1xf32> to vector<8x64xf32>
    %126 = arith.mulf %125, %88 : vector<8x64xf32>
    %127 = arith.addf %123, %126 : vector<8x64xf32>
    %c0_74 = arith.constant 0 : index
    %c0_75 = arith.constant 0 : index
    %128 = vector.load %arg6[%c0_74, %c0_75] : memref<8x9xf32, #tpu.memory_space<vmem>>, vector<8x1xf32>
    %129 = vector.extract_strided_slice %88 {offsets = [0, 0], sizes = [8, 56], strides = [1, 1]} : vector<8x64xf32> to vector<8x56xf32>
    %130 = tpu.concatenate %84, %129 in 1 : vector<8x8xf32>, vector<8x56xf32> -> vector<8x64xf32>
    %131 = vector.broadcast %128 : vector<8x1xf32> to vector<8x64xf32>
    %132 = arith.mulf %131, %130 : vector<8x64xf32>
    %133 = arith.addf %127, %132 : vector<8x64xf32>
    %c0_76 = arith.constant 0 : index
    %c0_77 = arith.constant 0 : index
    %134 = vector.load %arg7[%c0_76, %c0_77] : memref<8x1xf32, #tpu.memory_space<vmem>>, vector<8x1xf32>
    %135 = vector.broadcast %134 : vector<8x1xf32> to vector<8x64xf32>
    %136 = arith.mulf %133, %135 : vector<8x64xf32>
    %c0_78 = arith.constant 0 : index
    %c0_79 = arith.constant 0 : index
    %137 = vector.load %arg8[%c0_78, %c0_79] : memref<8x1xf32, #tpu.memory_space<vmem>>, vector<8x1xf32>
    %138 = vector.broadcast %137 : vector<8x1xf32> to vector<8x64xf32>
    %139 = arith.addf %136, %138 : vector<8x64xf32>
    %cst_80 = arith.constant 0.000000e+00 : f32
    %140 = vector.broadcast %cst_80 : f32 to vector<8x64xf32>
    %141 = arith.cmpf oge, %139, %140 : vector<8x64xf32>
    %c0_81 = arith.constant 0 : index
    %c0_82 = arith.constant 0 : index
    %142 = vector.load %arg9[%c0_81, %c0_82] : memref<8x1xf32, #tpu.memory_space<vmem>>, vector<8x1xf32>
    %143 = vector.broadcast %142 : vector<8x1xf32> to vector<8x64xf32>
    %144 = arith.mulf %143, %139 : vector<8x64xf32>
    %145 = arith.select %141, %139, %144 : vector<8x64xi1>, vector<8x64xf32>
    %c0_83 = arith.constant 0 : index
    %c0_84 = arith.constant 0 : index
    %146 = vector.load %arg10[%c0_83, %c0_84] : memref<8x8xf32, #tpu.memory_space<vmem>>, vector<8x8xf32>
    %cst_85 = arith.constant dense<0.000000e+00> : vector<8x64xf32>
    %147 = tpu.matmul %146, %145, %cst_85 {dimension_numbers = #tpu.dot_dimension_numbers<[1], [0], [0], [1], [0, 0, 1, 1], [], []>} : vector<8x8xf32>, vector<8x64xf32>, vector<8x64xf32> -> vector<8x64xf32>
    %c0_86 = arith.constant 0 : index
    %c0_87 = arith.constant 0 : index
    %148 = vector.load %arg11[%c0_86, %c0_87] : memref<8x1xf32, #tpu.memory_space<vmem>>, vector<8x1xf32>
    %149 = vector.broadcast %148 : vector<8x1xf32> to vector<8x64xf32>
    %150 = arith.mulf %147, %149 : vector<8x64xf32>
    %c0_88 = arith.constant 0 : index
    %c0_89 = arith.constant 0 : index
    %151 = vector.load %arg12[%c0_88, %c0_89] : memref<8x1xf32, #tpu.memory_space<vmem>>, vector<8x1xf32>
    %152 = vector.broadcast %151 : vector<8x1xf32> to vector<8x64xf32>
    %153 = arith.addf %150, %152 : vector<8x64xf32>
    %c0_90 = arith.constant 0 : index
    %c0_91 = arith.constant 0 : index
    %c0_92 = arith.constant 0 : index
    %154 = vector.load %arg13[%c0_90, %c0_91, %c0_92] : memref<1x8x64xf32, #tpu.memory_space<vmem>>, vector<1x8x64xf32>
    %155 = vector.shape_cast %154 : vector<1x8x64xf32> to vector<8x64xf32>
    %156 = vector.shape_cast %153 : vector<8x64xf32> to vector<1x8x64xf32>
    tpu.vector_store %arg13[%c0_90, %c0_91, %c0_92], %156 {strides = array<i32>} : memref<1x8x64xf32, #tpu.memory_space<vmem>>, vector<1x8x64xf32>,
    return
  }
  func.func @transform_0(%arg0: i32) -> (i32, i32, i32, i32, i32) {
    %c0_i32 = arith.constant 0 : i32
    %c0_i32_0 = arith.constant 0 : i32
    %c0_i32_1 = arith.constant 0 : i32
    %c0_i32_2 = arith.constant 0 : i32
    %c0_i32_3 = arith.constant 0 : i32
    return %arg0, %c0_i32, %c0_i32_0, %c0_i32_1, %c0_i32_2 : i32, i32, i32, i32, i32
  }
  func.func @transform_1(%arg0: i32) -> (i32, i32) {
    %c0_i32 = arith.constant 0 : i32
    %c0_i32_0 = arith.constant 0 : i32
    %c0_i32_1 = arith.constant 0 : i32
    return %c0_i32, %c0_i32_0 : i32, i32
  }
  func.func @transform_2(%arg0: i32) -> (i32, i32) {
    %c0_i32 = arith.constant 0 : i32
    %c0_i32_0 = arith.constant 0 : i32
    %c0_i32_1 = arith.constant 0 : i32
    return %c0_i32, %c0_i32_0 : i32, i32
  }
  func.func @transform_3(%arg0: i32) -> (i32, i32) {
    %c0_i32 = arith.constant 0 : i32
    %c0_i32_0 = arith.constant 0 : i32
    %c0_i32_1 = arith.constant 0 : i32
    return %c0_i32, %c0_i32_0 : i32, i32
  }
  func.func @transform_4(%arg0: i32) -> (i32, i32) {
    %c0_i32 = arith.constant 0 : i32
    %c0_i32_0 = arith.constant 0 : i32
    %c0_i32_1 = arith.constant 0 : i32
    return %c0_i32, %c0_i32_0 : i32, i32
  }
  func.func @transform_5(%arg0: i32) -> (i32, i32) {
    %c0_i32 = arith.constant 0 : i32
    %c0_i32_0 = arith.constant 0 : i32
    %c0_i32_1 = arith.constant 0 : i32
    return %c0_i32, %c0_i32_0 : i32, i32
  }
  func.func @transform_6(%arg0: i32) -> (i32, i32) {
    %c0_i32 = arith.constant 0 : i32
    %c0_i32_0 = arith.constant 0 : i32
    %c0_i32_1 = arith.constant 0 : i32
    return %c0_i32, %c0_i32_0 : i32, i32
  }
  func.func @transform_7(%arg0: i32) -> (i32, i32) {
    %c0_i32 = arith.constant 0 : i32
    %c0_i32_0 = arith.constant 0 : i32
    %c0_i32_1 = arith.constant 0 : i32
    return %c0_i32, %c0_i32_0 : i32, i32
  }
  func.func @transform_8(%arg0: i32) -> (i32, i32) {
    %c0_i32 = arith.constant 0 : i32
    %c0_i32_0 = arith.constant 0 : i32
    %c0_i32_1 = arith.constant 0 : i32
    return %c0_i32, %c0_i32_0 : i32, i32
  }
  func.func @transform_9(%arg0: i32) -> (i32, i32) {
    %c0_i32 = arith.constant 0 : i32
    %c0_i32_0 = arith.constant 0 : i32
    %c0_i32_1 = arith.constant 0 : i32
    return %c0_i32, %c0_i32_0 : i32, i32
  }
  func.func @transform_10(%arg0: i32) -> (i32, i32) {
    %c0_i32 = arith.constant 0 : i32
    %c0_i32_0 = arith.constant 0 : i32
    %c0_i32_1 = arith.constant 0 : i32
    return %c0_i32, %c0_i32_0 : i32, i32
  }
  func.func @transform_11(%arg0: i32) -> (i32, i32) {
    %c0_i32 = arith.constant 0 : i32
    %c0_i32_0 = arith.constant 0 : i32
    %c0_i32_1 = arith.constant 0 : i32
    return %c0_i32, %c0_i32_0 : i32, i32
  }
  func.func @transform_12(%arg0: i32) -> (i32, i32, i32) {
    %c0_i32 = arith.constant 0 : i32
    %c0_i32_0 = arith.constant 0 : i32
    %c0_i32_1 = arith.constant 0 : i32
    return %arg0, %c0_i32, %c0_i32_0 : i32, i32, i32
  }
}

</mosaic_0001>

<bundles_post_ra>
// kernel: depthwise_forward.1
= control target key start
LH: loop header
LB: loop body
LE: loop exit
PB: predicated region body
PF: predicated region fallthrough
CT: control target
= control target key end

     0   :  { %s1196_s21 = smov 0   ;;  %s1286_s0 = inlined_call_operand.vmem [shape: f32[2,2,2,4,64], index: 0, kind: input, shape index: {}]   ;;  %s1287_s1 = inlined_call_operand.vmem [shape: f32[8,4], index: 1, kind: input, shape index: {}]   ;;  %s1288_s2 = inlined_call_operand.vmem [shape: f32[8,1], index: 2, kind: input, shape index: {}]   ;;  %s1289_s3 = inlined_call_operand.vmem [shape: f32[8,1], index: 3, kind: input, shape index: {}]   ;;  %s1290_s4 = inlined_call_operand.vmem [shape: f32[8,1], index: 4, kind: input, shape index: {}]   ;;  %s1291_s5 = inlined_call_operand.vmem [shape: f32[8,9], index: 5, kind: input, shape index: {}]   ;;  %s1292_s6 = inlined_call_operand.vmem [shape: f32[8,1], index: 6, kind: input, shape index: {}]   ;;  %s1293_s7 = inlined_call_operand.vmem [shape: f32[8,1], index: 7, kind: input, shape index: {}]   ;;  %s1294_s8 = inlined_call_operand.vmem [shape: f32[8,1], index: 8, kind: input, shape index: {}]   ;;  %s1295_s9 = inlined_call_operand.vmem [shape: f32[8,8], index: 9, kind: input, shape index: {}]   ;;  %s1296_s10 = inlined_call_operand.vmem [shape: f32[8,1], index: 10, kind: input, shape index: {}]   ;;  %s1297_s11 = inlined_call_operand.vmem [shape: f32[8,1], index: 11, kind: input, shape index: {}]   ;;  %s1298_s12 = inlined_call_operand.vmem [shape: f32[2,8,64], index: 12, kind: output, shape index: {}]  }
   0x1 LB: > { %s1019_s22 = sadd.s32 4294967295, %s1116_s21   ;;  %p1023_p0 = scmp.ge.s32.totalorder %s1116_s21, 1  ;;  %s1116_s21 = sphi %s1196_s21, %s22_s21  }
   0x2   : > { %p362_p1 = scmp.lt.s32.totalorder %s1116_s21, 3 }
   0x4   : > { %p363_p2 = pnand %p1023_p0, %p362_p1 }
   0x5   : > { %p403_p3 = scmp.lt.s32.totalorder (!%p363_p2), %s1019_s22, 1  ;;  %s1126_s19 = smov (!%p363_p2), 1  }
   0x6   : > { %366 = sbr.rel (%p363_p2) target bundleno = 670 (0x29e), region = 68  ;;  %s1130_s20 = smov (!%p363_p2), 8  }
   0xb   : > { %v1118_v0 = vmov 0.0   ;;  %v492_v1 = vld [vmem:[%s1288_s2] sm:$0xff]  ;;  %s1302_s22 = smov (!%p403_p3, %s1019_s22), 1  ;;  %vm1119_vm0 = vmmov 0   ;;  %v1120_v3 = vmov 0   ;;  %vm418_vm1 = vcmask 1043456  }
   0xc   : > { %1052 = vmatprep.subr.mxu0 %v1118_v0  ;;  %1057 = vmatprep.subr.mxu1 %v1118_v0  ;;  %v507_v2 = vld [vmem:[%s1290_s4] sm:$0xff]  ;;  %s1041_s27 = sshll.u32 %s1302_s22, 4  ;;  %vm414_vm2 = vcmask 31744   ;;  %v1121_v11 = vmov 4   ;;  %v1122_v12 = vmov 7   ;;  %v1123_v13 = vmov 8  }
   0xd   : > { %1054 = vmatprep.mubr.msk.f32.mxu0 %vm1119_vm0, %v1118_v0  ;;  %1059 = vmatprep.mubr.msk.f32.mxu1 %vm1119_vm0, %v1118_v0  ;;  %s407_s30 = scalar_lea.vmem %s1286_s0, %s1041_s27  ;;  %v412_v4 = vld [vmem:[%s1287_s1] sm:$0xff]  ;;  %v1124_v14 = vmov 6   ;;  %v1125_v15 = vmov 5   ;;  %v1127_v34 = vmov 3   ;;  %v1128_v36 = vmov 1   ;;  %s1026_s17 = sshll.u32 %s1302_s22, 3 }
   0xe   : > { %1098 = vset.pattern.permute.xlu0 %v1120_v3  ;;  %1099 = vset.pattern.permute.xlu1 %v1120_v3  ;;  %v413_v5 = vld [vmem:[%s407_s30] sm:$0xf]  ;;  %v1029_v6 = vld [vmem:[%s407_s30 + $0x4] sm:$0xf]  ;;  %v1032_v7 = vld [vmem:[%s407_s30 + $0x8] sm:$0xf]  ;;  %v755_v45 = vlaneseq }
   0xf   : > { %495 = vperm.xlu0 %1098, %v492_v1   ;;  %510 = vperm.xlu1 %1099, %v507_v2   ;;  %v1035_v8 = vld [vmem:[%s407_s30 + $0xc] sm:$0xf]  ;;  %v499_v9 = vld [vmem:[%s1289_s3] sm:$0xff]  ;;  %v1129_v38 = vmov 2   ;;  %vm774_vm6 = vcmask 7168   ;;  %vm812_vm9 = vcmask 64512  }
  0x10   : > { %1053 = vmatpush3.msk.msra.mxu0 %vm418_vm1, %v413_v5  ;;  %1058 = vmatpush3.msk.msra.mxu1 %vm418_vm1, %v1029_v6  ;;  %v777_v10 = vld [vmem:[%s1291_s5] sm:$0xff]  ;;  %v756_v46 = vand.u32 127, %v755_v45  ;;  %vm964_vm11 = vcmask 523264  }
  0x11   : > { %1055 = vmatmul.mubr.msk.f32.vlgmr.msra.gmra.mxu0 %vm414_vm2, %v412_v4  ;;  %1060 = vmatmul.mubr.msk.f32.vlgmr.msra.gmra.mxu1 %vm414_vm2, %v412_v4  ;;  %v853_v42 = vld [vmem:[%s1292_s6] sm:$0xff] }
  0x12   : > { %1062 = vmatprep.subr.mxu0 %v1118_v0  ;;  %1067 = vmatprep.subr.mxu1 %v1118_v0  ;;  %v868_v43 = vld [vmem:[%s1294_s8] sm:$0xff]  ;;  %v761_v47 = vand.u32 7, %v756_v46 }
  0x13   : > { %1063 = vmatpush3.msk.msra.mxu0 %vm418_vm1, %v1032_v7  ;;  %1064 = vmatprep.mubr.msk.f32.mxu0 %vm1119_vm0, %v1118_v0  ;;  %v950_v44 = vld [vmem:[%s1296_s10] sm:$0xff] }
  0x14   : > { %1068 = vmatpush3.msk.msra.mxu1 %vm418_vm1, %v1035_v8  ;;  %1069 = vmatprep.mubr.msk.f32.mxu1 %vm1119_vm0, %v1118_v0  ;;  %vm1255_vm7 = vcmp.eq.s32.totalorder %v761_v47, 0  ;;  %v860_v52 = vld [vmem:[%s1293_s7] sm:$0xff] }
  0x15   : > { %1065 = vmatmul.mubr.msk.f32.vlgmr.msra.gmra.mxu0 %vm414_vm2, %v412_v4  ;;  %1070 = vmatmul.mubr.msk.f32.vlgmr.msra.gmra.mxu1 %vm414_vm2, %v412_v4  ;;  %v957_v54 = vld [vmem:[%s1297_s11] sm:$0xff] }
  0x16   : > { %502 = vperm.xlu0 %1098, %v499_v9   ;;  %1072 = vmatprep.subr.mxu0 %v1118_v0 }
  0x17   : > { %1074 = vmatprep.mubr.msk.f32.mxu0 %vm1119_vm0, %v1118_v0  ;;  %1101 = vset.pattern.permute.xlu1 %v1125_v15 }
  0x1a   : > { %1100 = vset.pattern.permute.xlu0 %v1121_v11 }
  0x1b   : > { %780 = vperm.xlu0 %1100, %v777_v10  }
  0x1f   : > { %1103 = vset.pattern.permute.xlu0 %v1122_v12 }
  0x20   : > { %803 = vperm.xlu0 %1103, %v777_v10  }
  0x24   : > { %1105 = vset.pattern.permute.xlu0 %v1123_v13 }
  0x25   : > { %821 = vperm.xlu0 %1105, %v777_v10  }
  0x29   : > { %1107 = vset.pattern.permute.xlu0 %v1124_v14 }
  0x2a   : > { %837 = vperm.xlu0 %1107, %v777_v10  }
  0x2e   : > { %1109 = vset.pattern.permute.xlu0 %v1120_v3 }
  0x8a   : > { %v496_v18 = vpop.permute.xlu0 %495  ;;  %v511_v28 = vpop.permute.xlu1 %510 }
  0x91   : > { %v503_v26 = vpop.permute.xlu0 %502 }
  0x96   : > { %v781_v59 = vpop.permute.xlu0 %780 }
  0x9b   : > { %v804_v4 = vpop.permute.xlu0 %803 }
  0xa0   : > { %v822_v12 = vpop.permute.xlu0 %821 }
  0xd1   : > { %v488_v16 = vpop.f32.mrf.mxu0  ;;  %v586_v17 = vpop.f32.mrf.mxu1 }
  0xd2   : > { %v590_v31 = vmul.f32 %v586_v17, %v496_v18  ;;  %v498_v53 = vmul.f32 %v496_v18, %v488_v16 }
  0xd3   : > { %v1056_v19 = vpop.f32.mrf.mxu0  ;;  %v1061_v20 = vpop.f32.mrf.mxu1 }
  0xd4   : > { %v591_v32 = vadd.f32 %v590_v31, %v503_v26  ;;  %v505_v55 = vadd.f32 %v503_v26, %v498_v53 }
  0xd5   : > { %v666_v21 = vpop.f32.mrf.mxu0  ;;  %v746_v22 = vpop.f32.mrf.mxu1 }
  0xd6   : > { %v750_v23 = vmul.f32 %v746_v22, %v496_v18  ;;  %v593_v33 = vmul.f32 %v591_v32, %v511_v28  ;;  %vm592_vm4 = vcmp.ge.f32.partialorder %v591_v32, 0.0  ;;  %v670_v37 = vmul.f32 %v666_v21, %v496_v18  ;;  %v838_v18 = vpop.permute.xlu0 %837 }
  0xd7   : > { %v1071_v24 = vpop.f32.mrf.mxu1  ;;  %v1066_v25 = vpop.f32.mrf.mxu0  ;;  %v513_v57 = vmul.f32 %v511_v28, %v505_v55  ;;  %vm506_vm8 = vcmp.ge.f32.partialorder %v505_v55, 0.0 }
  0xd8   : > { %v751_v27 = vadd.f32 %v750_v23, %v503_v26  ;;  %v594_v35 = vsel %vm592_vm4, %v591_v32, %v593_v33  ;;  %v671_v39 = vadd.f32 %v670_v37, %v503_v26 }
  0xd9   : > { %v514_v60 = vsel %vm506_vm8, %v505_v55, %v513_v57 }
  0xda   : > { %v753_v29 = vmul.f32 %v751_v27, %v511_v28  ;;  %vm752_vm3 = vcmp.ge.f32.partialorder %v751_v27, 0.0  ;;  %v673_v40 = vmul.f32 %v671_v39, %v511_v28  ;;  %vm672_vm5 = vcmp.ge.f32.partialorder %v671_v39, 0.0 }
  0xdb   : > { %v783_v63 = vmul.f32 %v781_v59, %v514_v60 }
  0xdc   : > { %v1241_v30 = vsel %vm752_vm3, %v751_v27, %v753_v29  ;;  %v674_v41 = vsel %vm672_vm5, %v671_v39, %v673_v40 }
  0xdd   : > { %771 = vrot.lane.b32.xlu1 %v1241_v30, %s1126_s19  ;;  %v806_v6 = vmul.f32 %v804_v4, %v674_v41  ;;  %v824_v15 = vmul.f32 %v822_v12, %v1241_v30 }
  0xe1   : > { %785 = vperm.xlu1 %1101, %v777_v10  }
  0xe5   : > { %1102 = vset.pattern.permute.xlu1 %v1127_v34 }
  0xe6   : > { %797 = vperm.xlu1 %1102, %v777_v10  }
  0xea   : > { %791 = vrot.lane.b32.xlu1 %v594_v35, %s1126_s19 }
  0xeb   : > { %1104 = vset.pattern.permute.xlu1 %v1128_v36 }
  0xee   : > { %815 = vperm.xlu1 %1104, %v777_v10  }
  0xf2   : > { %1106 = vset.pattern.permute.xlu1 %v1129_v38 }
  0xf3   : > { %831 = vperm.xlu1 %1106, %v777_v10  }
  0xf7   : > { %1108 = vset.pattern.permute.xlu1 %v1120_v3 }
  0xf8   : > { %848 = vperm.xlu1 %1108, %v777_v10  }
  0xfc   : > { %809 = vrot.lane.b32.xlu1 %v674_v41, %s1130_s20 }
 0x100   : > { %826 = vrot.lane.b32.xlu1 %v1241_v30, %s1130_s20 }
 0x104   : > { %856 = vperm.xlu1 %1108, %v853_v42  }
 0x108   : > { %871 = vperm.xlu1 %1108, %v868_v43  }
 0x10c   : > { %953 = vperm.xlu1 %1108, %v950_v44  }
 0x14f   : > { %v772_v49 = vpop.permute.xlu1 %771 }
 0x150   : > { %v775_v50 = vsel %vm774_vm6, 0.0, %v772_v49 }
 0x151   : > { %v776_v51 = vsel %vm1255_vm7, 0.0, %v775_v50 }
 0x152   : > { %843 = vrot.lane.b32.xlu0 %v776_v51, %s1130_s20  ;;  %v840_v22 = vmul.f32 %v838_v18, %v776_v51  ;;  %s411_s20 = scalar_lea.vmem %s1298_s12, %s1026_s17 }
 0x156   : > { %863 = vperm.xlu0 %1109, %v860_v52  }
 0x15a   : > { %960 = vperm.xlu0 %1109, %v957_v54  }
 0x15c   : > { %v786_v56 = vpop.permute.xlu1 %785 }
 0x15d   : > { %v788_v61 = vmul.f32 %v786_v56, %v594_v35  ;;  %v876_v35 = vld [vmem:[%s1295_s9] sm:$0xff] }
 0x15f   : > { %v789_v2 = vadd.f32 %v788_v61, %v783_v63 }
 0x161   : > { %v798_v58 = vpop.permute.xlu1 %797 }
 0x165   : > { %v792_v62 = vpop.permute.xlu1 %791 }
 0x166   : > { %v794_v0 = vsel %vm774_vm6, 0.0, %v792_v62 }
 0x167   : > { %v795_v1 = vsel %vm1255_vm7, 0.0, %v794_v0 }
 0x168   : > { %v800_v3 = vmul.f32 %v798_v58, %v795_v1 }
 0x169   : > { %v816_v5 = vpop.permute.xlu1 %815 }
 0x16a   : > { %v801_v7 = vadd.f32 %v800_v3, %v789_v2 }
 0x16c   : > { %v807_v8 = vadd.f32 %v806_v6, %v801_v7 }
 0x16e   : > { %v832_v9 = vpop.permute.xlu1 %831 }
 0x173   : > { %v849_v10 = vpop.permute.xlu1 %848 }
 0x177   : > { %v810_v11 = vpop.permute.xlu1 %809 }
 0x178   : > { %v813_v13 = vsel %vm812_vm9, 0.0, %v810_v11 }
 0x179   : > { %v818_v14 = vmul.f32 %v816_v5, %v813_v13 }
 0x17b   : > { %v819_v16 = vadd.f32 %v818_v14, %v807_v8  ;;  %v827_v17 = vpop.permute.xlu1 %826 }
 0x17c   : > { %v829_v19 = vsel %vm812_vm9, 0.0, %v827_v17 }
 0x17d   : > { %v825_v20 = vadd.f32 %v824_v15, %v819_v16  ;;  %v834_v21 = vmul.f32 %v832_v9, %v829_v19 }
 0x17f   : > { %v835_v23 = vadd.f32 %v834_v21, %v825_v20  ;;  %v857_v29 = vpop.permute.xlu1 %856 }
 0x181   : > { %v841_v24 = vadd.f32 %v840_v22, %v835_v23 }
 0x183   : > { %v872_v33 = vpop.permute.xlu1 %871 }
 0x187   : > { %v954_v37 = vpop.permute.xlu1 %953 }
 0x1c4   : > { %v844_v25 = vpop.permute.xlu0 %843 }
 0x1c5   : > { %v846_v26 = vsel %vm812_vm9, 0.0, %v844_v25 }
 0x1c6   : > { %v851_v27 = vmul.f32 %v849_v10, %v846_v26 }
 0x1c8   : > { %v852_v28 = vadd.f32 %v851_v27, %v841_v24 }
 0x1ca   : > { %v859_v31 = vmul.f32 %v857_v29, %v852_v28 }
 0x1d1   : > { %v864_v32 = vpop.permute.xlu0 %863 }
 0x1d2   : > { %v866_v30 = vadd.f32 %v864_v32, %v859_v31 }
 0x1d4   : > { %vm867_vm10 = vcmp.ge.f32.partialorder %v866_v30, 0.0  ;;  %v874_v34 = vmul.f32 %v872_v33, %v866_v30 }
 0x1d5   : > { %v961_v40 = vpop.permute.xlu0 %960 }
 0x1d6   : > { %v875_v36 = vsel %vm867_vm10, %v866_v30, %v874_v34 }
 0x1d7   : > { %1073 = vmatpush3.msra.mxu0 %v875_v36 }
 0x1d8   : > { %1075 = vmatmul.mubr.msk.f32.vlgmr.msra.gmra.mxu0 %vm812_vm9, %v876_v35 }
 0x298   : > { %v946_v38 = vpop.f32.mrf.mxu0 }
 0x299   : > { %v956_v39 = vmul.f32 %v954_v37, %v946_v38 }
 0x29a   : > { %v1076_v41 = vpop.f32.mrf.mxu0 }
 0x29b   : > { %v963_v42 = vadd.f32 %v961_v40, %v956_v39 }
 0x29d   : > { %965 = vst.msk [vmem:[%s411_s20] sm:$0xff] %vm964_vm11, %v963_v42 }
 0x29e PF: > { %s22_s21 = sadd.s32 1, %s1116_s21  }
 0x29f   : > { %p19_p4 = scmp.ge.s32.totalorder %s22_s21, 4  }
 0x2a1   :  { %21 = sbr.rel (!%p19_p4) target bundleno = 1 (0x1), region = 101 }

</bundles_post_ra>
